<compile_context>
chip_gen: v7x
topology: tpu7x:2x2x1
jax: 0.10.0
libtpu: 0.0.40
codegen_flags: <defaults>
</compile_context>

<pallas_src>
import functools

import jax
import jax.numpy as jnp
from jax.experimental import pallas as pl
from jax.experimental.pallas import tpu as pltpu


def _round_up(x, m):
    return (x + m - 1) // m * m


# Single-buffering of constant-index blocks (halves their VMEM footprint).
_HAS_BUFFERED = hasattr(pl, "Buffered")


def _const_spec(shape):
    idx = lambda i, k: (0, 0)
    if _HAS_BUFFERED:
        try:
            return pl.BlockSpec(shape, idx, pipeline_mode=pl.Buffered(1))
        except TypeError:  # older API without pipeline_mode
            pass
    return pl.BlockSpec(shape, idx)


def _vmem_capacity_bytes():
    try:
        return int(pltpu.get_tpu_info().vmem_capacity_bytes)
    except Exception:
        return 64 << 20  # conservative (v7x per-TensorCore VMEM)


# ---------------------------------------------------------------------------
# Kernel
# ---------------------------------------------------------------------------
def _mlp_kernel(x_ref,
                w1_ref, b1_ref,
                w2_ref, b2_ref,
                w3_ref, b3_ref,
                w4_ref, b4_ref,
                mid_ref, logits_ref,
                acc_ref):
    # NOTE: this kernel requires the K (reduction) axis to be the *innermost*
    # grid axis and the output block index to be constant along it; the
    # outputs are written only at the final K step.
    k = pl.program_id(1)

    @pl.when(k == 0)
    def _():
        acc_ref[...] = jnp.zeros_like(acc_ref)

    # Layer 1 partial product, accumulated over the K (d_in) grid axis.
    acc_ref[...] += jnp.dot(x_ref[...], w1_ref[...],
                            preferred_element_type=jnp.float32)

    @pl.when(k == pl.num_programs(1) - 1)
    def _():
        # Bias + ReLU only once, at the final K step.
        h1 = jnp.maximum(acc_ref[...] + b1_ref[...], 0.0)
        h1 = h1.astype(w2_ref.dtype)

        h2 = jnp.dot(h1, w2_ref[...], preferred_element_type=jnp.float32)
        h2 = jnp.maximum(h2 + b2_ref[...], 0.0)
        h2 = h2.astype(w3_ref.dtype)

        h3 = jnp.dot(h2, w3_ref[...], preferred_element_type=jnp.float32)
        h3 = jnp.maximum(h3 + b3_ref[...], 0.0)
        mid_ref[...] = h3.astype(mid_ref.dtype)

        lg = jnp.dot(h3.astype(w4_ref.dtype), w4_ref[...],
                     preferred_element_type=jnp.float32)
        logits_ref[...] = (lg + b4_ref[...]).astype(logits_ref.dtype)


# ---------------------------------------------------------------------------
# Parameter preparation (hoisted out of the per-call hot path)
# ---------------------------------------------------------------------------
def prepare_params(params, *, weight_dtype=jnp.bfloat16):
    """Pad (lane-dense, multiples of 128) and cast weights ONCE.

    Returns (padded_params, meta).  `padded_params` is a tuple of arrays
    (a traced pytree); `meta` is a dict of static Python ints / dtypes that
    should be bound via functools.partial (outside jit tracing).
    """
    w1, b1, w2, b2, w3, b3, w4, b4 = params
    b1, b2, b3, b4 = (b.reshape(1, -1) for b in (b1, b2, b3, b4))

    d_in, d_h1 = w1.shape
    d_h2 = w2.shape[1]
    D = w3.shape[1]
    C = w4.shape[1]

    cdtype = jnp.float32 if weight_dtype is None else weight_dtype

    d_in_p = _round_up(d_in, 128)
    h1p = _round_up(d_h1, 128)
    h2p = _round_up(d_h2, 128)
    Dp = _round_up(D, 128)
    Cp = _round_up(C, 128)

    def pad2(a, r, c, dt):
        a = a.astype(dt)
        return jnp.pad(a, ((0, r - a.shape[0]), (0, c - a.shape[1])))

    padded = (
        pad2(w1, d_in_p, h1p, cdtype),
        pad2(b1, 1, h1p, jnp.float32),
        pad2(w2, h1p, h2p, cdtype),
        pad2(b2, 1, h2p, jnp.float32),
        pad2(w3, h2p, Dp, cdtype),
        pad2(b3, 1, Dp, jnp.float32),
        pad2(w4, Dp, Cp, cdtype),
        pad2(b4, 1, Cp, jnp.float32),
    )
    meta = dict(d_in=d_in, D=D, C=C,
                d_in_p=d_in_p, h1p=h1p, h2p=h2p, Dp=Dp, Cp=Cp,
                weight_dtype=cdtype)
    return padded, meta


# ---------------------------------------------------------------------------
# Tile / VMEM sizing (generation-aware)
# ---------------------------------------------------------------------------
def _choose_tiles(B, d_in_p, h1p, h2p, Dp, Cp, cdtype, tile_b, tile_k):
    itemsize = jnp.dtype(cdtype).itemsize
    vmem_cap = _vmem_capacity_bytes()
    budget = vmem_cap - (8 << 20)          # headroom for compiler internals

    res_factor = 1 if _HAS_BUFFERED else 2  # Buffered(1) => single buffer
    bytes_resident = res_factor * (
        (h1p * h2p + h2p * Dp + Dp * Cp) * itemsize
        + (h1p + h2p + Dp + Cp) * 4)

    sub = 16 if itemsize == 2 else 8
    if tile_b is None:
        tile_b = min(512, _round_up(B, sub))
    tile_b = max(sub, _round_up(tile_b, sub))

    def footprint(tb, tk):
        bytes_stream = 2 * (tb * tk + tk * h1p) * itemsize   # x & w1 dbl-buf
        bytes_out = 2 * tb * (Dp + Cp) * 4                   # dbl-buf outputs
        bytes_acc = tb * h1p * 4                             # f32 accumulator
        bytes_act = tb * (h1p + h2p) * 4                     # epilogue temps
        return bytes_stream + bytes_out + bytes_acc + bytes_act

    m = d_in_p // 128
    if tile_k is not None:
        # Snap down to the largest multiple-of-128 divisor of d_in_p.
        cap = max(128, tile_k)
        tile_k = 128
        for d in range(1, m + 1):
            if m % d == 0 and 128 * d <= cap:
                tile_k = 128 * d
    else:
        cap_k = 2048 if itemsize <= 2 else 1024
        tile_k = 128
        for d in range(1, m + 1):
            if m % d:
                continue
            tk = 128 * d
            if tk > cap_k:
                continue
            if bytes_resident + footprint(tile_b, tk) <= budget:
                tile_k = tk

    # Shrink the batch tile if the selected slabs still overflow the budget.
    while tile_b > sub and bytes_resident + footprint(tile_b, tile_k) > budget:
        tile_b = max(sub, _round_up(tile_b // 2, sub))

    vmem_limit = bytes_resident + footprint(tile_b, tile_k) + (4 << 20)
    vmem_limit = max(vmem_limit, 32 << 20)
    vmem_limit = int(min(vmem_limit, vmem_cap - (4 << 20)))
    return tile_b, tile_k, vmem_limit


# ---------------------------------------------------------------------------
# Forward pass
# ---------------------------------------------------------------------------
def final_classifier(fused_features, padded_params, meta, *,
                     tile_b=None, tile_k=None):
    """fused_features: (B, num_chunks, gpt_n_embd). Returns (middle, logits)."""
    (w1p, b1p, w2p, b2p, w3p, b3p, w4p, b4p) = padded_params
    d_in, D, C = meta["d_in"], meta["D"], meta["C"]
    d_in_p, h1p, h2p = meta["d_in_p"], meta["h1p"], meta["h2p"]
    Dp, Cp = meta["Dp"], meta["Cp"]
    cdtype = meta["weight_dtype"]

    B = fused_features.shape[0]
    x = fused_features.reshape(B, -1).astype(cdtype)  # == .view(B, -1), 1 cast
    assert x.shape[1] == d_in

    tile_b, tile_k, vmem_limit = _choose_tiles(
        B, d_in_p, h1p, h2p, Dp, Cp, cdtype, tile_b, tile_k)

    Bp = _round_up(B, tile_b)
    xp = jnp.pad(x, ((0, Bp - B), (0, d_in_p - d_in)))

    n_b = Bp // tile_b
    n_k = d_in_p // tile_k  # tile_k divides d_in_p by construction

    mid_p, logits_p = pl.pallas_call(
        _mlp_kernel,
        out_shape=(
            jax.ShapeDtypeStruct((Bp, Dp), jnp.float32),
            jax.ShapeDtypeStruct((Bp, Cp), jnp.float32),
        ),
        grid_spec=pltpu.PrefetchScalarGridSpec(
            num_scalar_prefetch=0,
            # K (reduction) axis MUST stay innermost: outputs are written only
            # at k == n_k - 1 with a k-constant output block index.
            grid=(n_b, n_k),
            in_specs=[
                pl.BlockSpec((tile_b, tile_k), lambda i, k: (i, k)),   # x
                pl.BlockSpec((tile_k, h1p), lambda i, k: (k, 0)),      # w1 (streamed)
                _const_spec((1, h1p)),                                 # b1
                _const_spec((h1p, h2p)),                               # w2 (resident)
                _const_spec((1, h2p)),                                 # b2
                _const_spec((h2p, Dp)),                                # w3
                _const_spec((1, Dp)),                                  # b3
                _const_spec((Dp, Cp)),                                 # w4
                _const_spec((1, Cp)),                                  # b4
            ],
            out_specs=(
                pl.BlockSpec((tile_b, Dp), lambda i, k: (i, 0)),
                pl.BlockSpec((tile_b, Cp), lambda i, k: (i, 0)),
            ),
            scratch_shapes=[pltpu.VMEM((tile_b, h1p), jnp.float32)],
        ),
        compiler_params=pltpu.CompilerParams(
            dimension_semantics=("parallel", "arbitrary"),
            vmem_limit_bytes=vmem_limit),
    )(xp, w1p, b1p, w2p, b2p, w3p, b3p, w4p, b4p)

    return mid_p[:B, :D], logits_p[:B, :C]


# ---------------------------------------------------------------------------
# Init / reference / test harness
# ---------------------------------------------------------------------------
def init_params(key, gpt_n_embd, num_chunks, num_classes):
    """Deterministic init. Weights stored (in, out) so kernel computes x @ W + b."""
    d_in = gpt_n_embd * num_chunks
    d_h1 = d_in // 2
    d_h2 = d_in // 4
    dims = [(d_in, d_h1), (d_h1, d_h2), (d_h2, gpt_n_embd),
            (gpt_n_embd, num_classes)]
    params = []
    for (fan_in, fan_out) in dims:
        key, kw, kb = jax.random.split(key, 3)
        bound = 1.0 / jnp.sqrt(fan_in)
        w = jax.random.uniform(kw, (fan_in, fan_out), jnp.float32, -bound, bound)
        b = jax.random.uniform(kb, (1, fan_out), jnp.float32, -bound, bound)
        params += [w, b]
    return tuple(params)


def _reference(x, params):
    w1, b1, w2, b2, w3, b3, w4, b4 = params
    x = x.reshape(x.shape[0], -1)
    h = jnp.maximum(x @ w1 + b1, 0.0)
    h = jnp.maximum(h @ w2 + b2, 0.0)
    mid = jnp.maximum(h @ w3 + b3, 0.0)
    return mid, mid @ w4 + b4


if __name__ == "__main__":
    gpt_n_embd = 32
    num_chunks = 8
    num_classes = 10
    batch = 2

    key = jax.random.PRNGKey(0)
    key, kx = jax.random.split(key)
    fused_features = jax.random.normal(
        kx, (batch, num_chunks, gpt_n_embd), jnp.float32)
    params = init_params(key, gpt_n_embd, num_chunks, num_classes)

    mid_ref, logits_ref = _reference(fused_features, params)

    # ---- f32 path (matches PyTorch numerics) ----
    padded_f32, meta_f32 = prepare_params(params, weight_dtype=jnp.float32)
    run_f32 = jax.jit(functools.partial(final_classifier, meta=meta_f32))
    mid, logits = run_f32(fused_features, padded_f32)
    jax.block_until_ready((mid, logits))
    assert mid.shape == (batch, gpt_n_embd)
    assert logits.shape == (batch, num_classes)
    assert jnp.allclose(mid, mid_ref, atol=1e-4, rtol=1e-4)
    assert jnp.allclose(logits, logits_ref, atol=1e-4, rtol=1e-4)

    # ---- default bf16 perf path (f32 MXU accumulation); loose tolerance,
    #      since x and weights are both quantized to bf16 ----
    padded_bf, meta_bf = prepare_params(params)  # weight_dtype=bf16 default
    run_bf = jax.jit(functools.partial(final_classifier, meta=meta_bf))
    mid_bf, logits_bf = run_bf(fused_features, padded_bf)
    jax.block_until_ready((mid_bf, logits_bf))
    assert mid_bf.shape == (batch, gpt_n_embd)
    assert logits_bf.shape == (batch, num_classes)
    assert jnp.allclose(logits_bf, logits_ref, atol=0.35, rtol=0.35)

    print("KERNEL_OK")
</pallas_src>

<mosaic_0001>
module attributes {stable_mosaic.version = 11 : i64} {
  func.func @_mlp_kernel(%arg0: i32, %arg1: i32, %arg2: memref<8x256xf32, #tpu.memory_space<vmem>>, %arg3: memref<256x128xf32, #tpu.memory_space<vmem>>, %arg4: memref<1x128xf32, #tpu.memory_space<vmem>>, %arg5: memref<128x128xf32, #tpu.memory_space<vmem>>, %arg6: memref<1x128xf32, #tpu.memory_space<vmem>>, %arg7: memref<128x128xf32, #tpu.memory_space<vmem>>, %arg8: memref<1x128xf32, #tpu.memory_space<vmem>>, %arg9: memref<128x128xf32, #tpu.memory_space<vmem>>, %arg10: memref<1x128xf32, #tpu.memory_space<vmem>>, %arg11: memref<8x128xf32, #tpu.memory_space<vmem>>, %arg12: memref<8x128xf32, #tpu.memory_space<vmem>>, %arg13: memref<8x128xf32, #tpu.memory_space<vmem>>) attributes {dimension_semantics = [#tpu.dimension_semantics<parallel>, #tpu.dimension_semantics<arbitrary>], iteration_bounds = array<i64: 1, 1>, scalar_prefetch = 0 : i64, scratch_operands = 1 : i64, tpu.core_type = #tpu.core_type<tc>, window_params = [{transform_indices = @transform_0, window_bounds = array<i64: 8, 256>}, {transform_indices = @transform_1, window_bounds = array<i64: 256, 128>}, {pipeline_mode = #tpu.pipeline_mode<synchronous>, transform_indices = @transform_2, window_bounds = array<i64: 1, 128>}, {pipeline_mode = #tpu.pipeline_mode<synchronous>, transform_indices = @transform_3, window_bounds = array<i64: 128, 128>}, {pipeline_mode = #tpu.pipeline_mode<synchronous>, transform_indices = @transform_4, window_bounds = array<i64: 1, 128>}, {pipeline_mode = #tpu.pipeline_mode<synchronous>, transform_indices = @transform_5, window_bounds = array<i64: 128, 128>}, {pipeline_mode = #tpu.pipeline_mode<synchronous>, transform_indices = @transform_6, window_bounds = array<i64: 1, 128>}, {pipeline_mode = #tpu.pipeline_mode<synchronous>, transform_indices = @transform_7, window_bounds = array<i64: 128, 128>}, {pipeline_mode = #tpu.pipeline_mode<synchronous>, transform_indices = @transform_8, window_bounds = array<i64: 1, 128>}, {transform_indices = @transform_9, window_bounds = array<i64: 8, 128>}, {transform_indices = @transform_10, window_bounds = array<i64: 8, 128>}]} {
    %c0_i32 = arith.constant 0 : i32
    %0 = arith.cmpi eq, %arg1, %c0_i32 : i32
    %1 = arith.extui %0 : i1 to i32
    %c0_i32_0 = arith.constant 0 : i32
    %2 = arith.cmpi ne, %1, %c0_i32_0 : i32
    scf.if %2 {
      %cst_10 = arith.constant 0.000000e+00 : f32
      %12 = vector.broadcast %cst_10 : f32 to vector<8x128xf32>
      %c0_11 = arith.constant 0 : index
      %c0_12 = arith.constant 0 : index
      %13 = vector.load %arg13[%c0_11, %c0_12] : memref<8x128xf32, #tpu.memory_space<vmem>>, vector<8x128xf32>
      tpu.vector_store %arg13[%c0_11, %c0_12], %12 {strides = array<i32>} : memref<8x128xf32, #tpu.memory_space<vmem>>, vector<8x128xf32>,
    } else {
    }
    %c0 = arith.constant 0 : index
    %c0_1 = arith.constant 0 : index
    %3 = vector.load %arg13[%c0, %c0_1] : memref<8x128xf32, #tpu.memory_space<vmem>>, vector<8x128xf32>
    %c0_2 = arith.constant 0 : index
    %c0_3 = arith.constant 0 : index
    %4 = vector.load %arg2[%c0_2, %c0_3] : memref<8x256xf32, #tpu.memory_space<vmem>>, vector<8x256xf32>
    %c0_4 = arith.constant 0 : index
    %c0_5 = arith.constant 0 : index
    %5 = vector.load %arg3[%c0_4, %c0_5] : memref<256x128xf32, #tpu.memory_space<vmem>>, vector<256x128xf32>
    %cst = arith.constant dense<0.000000e+00> : vector<8x128xf32>
    %6 = tpu.matmul %4, %5, %cst {dimension_numbers = #tpu.dot_dimension_numbers<[1], [0], [0], [1], [0, 0, 1, 1], [], []>} : vector<8x256xf32>, vector<256x128xf32>, vector<8x128xf32> -> vector<8x128xf32>
    %7 = arith.addf %3, %6 : vector<8x128xf32>
    %c0_6 = arith.constant 0 : index
    %c0_7 = arith.constant 0 : index
    %8 = vector.load %arg13[%c0_6, %c0_7] : memref<8x128xf32, #tpu.memory_space<vmem>>, vector<8x128xf32>
    tpu.vector_store %arg13[%c0_6, %c0_7], %7 {strides = array<i32>} : memref<8x128xf32, #tpu.memory_space<vmem>>, vector<8x128xf32>,
    %c0_i32_8 = arith.constant 0 : i32
    %9 = arith.cmpi eq, %arg1, %c0_i32_8 : i32
    %10 = arith.extui %9 : i1 to i32
    %c0_i32_9 = arith.constant 0 : i32
    %11 = arith.cmpi ne, %10, %c0_i32_9 : i32
    scf.if %11 {
      %c0_10 = arith.constant 0 : index
      %c0_11 = arith.constant 0 : index
      %12 = vector.load %arg13[%c0_10, %c0_11] : memref<8x128xf32, #tpu.memory_space<vmem>>, vector<8x128xf32>
      %c0_12 = arith.constant 0 : index
      %c0_13 = arith.constant 0 : index
      %13 = vector.load %arg4[%c0_12, %c0_13] : memref<1x128xf32, #tpu.memory_space<vmem>>, vector<1x128xf32>
      %14 = vector.broadcast %13 : vector<1x128xf32> to vector<8x128xf32>
      %15 = arith.addf %12, %14 : vector<8x128xf32>
      %cst_14 = arith.constant 0.000000e+00 : f32
      %16 = vector.broadcast %cst_14 : f32 to vector<8x128xf32>
      %17 = arith.maximumf %15, %16 : vector<8x128xf32>
      %c0_15 = arith.constant 0 : index
      %c0_16 = arith.constant 0 : index
      %18 = vector.load %arg5[%c0_15, %c0_16] : memref<128x128xf32, #tpu.memory_space<vmem>>, vector<128x128xf32>
      %cst_17 = arith.constant dense<0.000000e+00> : vector<8x128xf32>
      %19 = tpu.matmul %17, %18, %cst_17 {dimension_numbers = #tpu.dot_dimension_numbers<[1], [0], [0], [1], [0, 0, 1, 1], [], []>} : vector<8x128xf32>, vector<128x128xf32>, vector<8x128xf32> -> vector<8x128xf32>
      %c0_18 = arith.constant 0 : index
      %c0_19 = arith.constant 0 : index
      %20 = vector.load %arg6[%c0_18, %c0_19] : memref<1x128xf32, #tpu.memory_space<vmem>>, vector<1x128xf32>
      %21 = vector.broadcast %20 : vector<1x128xf32> to vector<8x128xf32>
      %22 = arith.addf %19, %21 : vector<8x128xf32>
      %cst_20 = arith.constant 0.000000e+00 : f32
      %23 = vector.broadcast %cst_20 : f32 to vector<8x128xf32>
      %24 = arith.maximumf %22, %23 : vector<8x128xf32>
      %c0_21 = arith.constant 0 : index
      %c0_22 = arith.constant 0 : index
      %25 = vector.load %arg7[%c0_21, %c0_22] : memref<128x128xf32, #tpu.memory_space<vmem>>, vector<128x128xf32>
      %cst_23 = arith.constant dense<0.000000e+00> : vector<8x128xf32>
      %26 = tpu.matmul %24, %25, %cst_23 {dimension_numbers = #tpu.dot_dimension_numbers<[1], [0], [0], [1], [0, 0, 1, 1], [], []>} : vector<8x128xf32>, vector<128x128xf32>, vector<8x128xf32> -> vector<8x128xf32>
      %c0_24 = arith.constant 0 : index
      %c0_25 = arith.constant 0 : index
      %27 = vector.load %arg8[%c0_24, %c0_25] : memref<1x128xf32, #tpu.memory_space<vmem>>, vector<1x128xf32>
      %28 = vector.broadcast %27 : vector<1x128xf32> to vector<8x128xf32>
      %29 = arith.addf %26, %28 : vector<8x128xf32>
      %cst_26 = arith.constant 0.000000e+00 : f32
      %30 = vector.broadcast %cst_26 : f32 to vector<8x128xf32>
      %31 = arith.maximumf %29, %30 : vector<8x128xf32>
      %c0_27 = arith.constant 0 : index
      %c0_28 = arith.constant 0 : index
      %32 = vector.load %arg11[%c0_27, %c0_28] : memref<8x128xf32, #tpu.memory_space<vmem>>, vector<8x128xf32>
      tpu.vector_store %arg11[%c0_27, %c0_28], %31 {strides = array<i32>} : memref<8x128xf32, #tpu.memory_space<vmem>>, vector<8x128xf32>,
      %c0_29 = arith.constant 0 : index
      %c0_30 = arith.constant 0 : index
      %33 = vector.load %arg9[%c0_29, %c0_30] : memref<128x128xf32, #tpu.memory_space<vmem>>, vector<128x128xf32>
      %cst_31 = arith.constant dense<0.000000e+00> : vector<8x128xf32>
      %34 = tpu.matmul %31, %33, %cst_31 {dimension_numbers = #tpu.dot_dimension_numbers<[1], [0], [0], [1], [0, 0, 1, 1], [], []>} : vector<8x128xf32>, vector<128x128xf32>, vector<8x128xf32> -> vector<8x128xf32>
      %c0_32 = arith.constant 0 : index
      %c0_33 = arith.constant 0 : index
      %35 = vector.load %arg10[%c0_32, %c0_33] : memref<1x128xf32, #tpu.memory_space<vmem>>, vector<1x128xf32>
      %36 = vector.broadcast %35 : vector<1x128xf32> to vector<8x128xf32>
      %37 = arith.addf %34, %36 : vector<8x128xf32>
      %c0_34 = arith.constant 0 : index
      %c0_35 = arith.constant 0 : index
      %38 = vector.load %arg12[%c0_34, %c0_35] : memref<8x128xf32, #tpu.memory_space<vmem>>, vector<8x128xf32>
      tpu.vector_store %arg12[%c0_34, %c0_35], %37 {strides = array<i32>} : memref<8x128xf32, #tpu.memory_space<vmem>>, vector<8x128xf32>,
    } else {
    }
    return
  }
  func.func @transform_0(%arg0: i32, %arg1: i32) -> (i32, i32) {
    %c0_i32 = arith.constant 0 : i32
    return %arg0, %arg1 : i32, i32
  }
  func.func @transform_1(%arg0: i32, %arg1: i32) -> (i32, i32) {
    %c0_i32 = arith.constant 0 : i32
    %c0_i32_0 = arith.constant 0 : i32
    return %arg1, %c0_i32 : i32, i32
  }
  func.func @transform_2(%arg0: i32, %arg1: i32) -> (i32, i32) {
    %c0_i32 = arith.constant 0 : i32
    %c0_i32_0 = arith.constant 0 : i32
    %c0_i32_1 = arith.constant 0 : i32
    return %c0_i32, %c0_i32_0 : i32, i32
  }
  func.func @transform_3(%arg0: i32, %arg1: i32) -> (i32, i32) {
    %c0_i32 = arith.constant 0 : i32
    %c0_i32_0 = arith.constant 0 : i32
    %c0_i32_1 = arith.constant 0 : i32
    return %c0_i32, %c0_i32_0 : i32, i32
  }
  func.func @transform_4(%arg0: i32, %arg1: i32) -> (i32, i32) {
    %c0_i32 = arith.constant 0 : i32
    %c0_i32_0 = arith.constant 0 : i32
    %c0_i32_1 = arith.constant 0 : i32
    return %c0_i32, %c0_i32_0 : i32, i32
  }
  func.func @transform_5(%arg0: i32, %arg1: i32) -> (i32, i32) {
    %c0_i32 = arith.constant 0 : i32
    %c0_i32_0 = arith.constant 0 : i32
    %c0_i32_1 = arith.constant 0 : i32
    return %c0_i32, %c0_i32_0 : i32, i32
  }
  func.func @transform_6(%arg0: i32, %arg1: i32) -> (i32, i32) {
    %c0_i32 = arith.constant 0 : i32
    %c0_i32_0 = arith.constant 0 : i32
    %c0_i32_1 = arith.constant 0 : i32
    return %c0_i32, %c0_i32_0 : i32, i32
  }
  func.func @transform_7(%arg0: i32, %arg1: i32) -> (i32, i32) {
    %c0_i32 = arith.constant 0 : i32
    %c0_i32_0 = arith.constant 0 : i32
    %c0_i32_1 = arith.constant 0 : i32
    return %c0_i32, %c0_i32_0 : i32, i32
  }
  func.func @transform_8(%arg0: i32, %arg1: i32) -> (i32, i32) {
    %c0_i32 = arith.constant 0 : i32
    %c0_i32_0 = arith.constant 0 : i32
    %c0_i32_1 = arith.constant 0 : i32
    return %c0_i32, %c0_i32_0 : i32, i32
  }
  func.func @transform_9(%arg0: i32, %arg1: i32) -> (i32, i32) {
    %c0_i32 = arith.constant 0 : i32
    %c0_i32_0 = arith.constant 0 : i32
    return %arg0, %c0_i32 : i32, i32
  }
  func.func @transform_10(%arg0: i32, %arg1: i32) -> (i32, i32) {
    %c0_i32 = arith.constant 0 : i32
    %c0_i32_0 = arith.constant 0 : i32
    return %arg0, %c0_i32 : i32, i32
  }
}

</mosaic_0001>

<bundles_post_ra>
// kernel: final_classifier.1
= control target key start
LH: loop header
LB: loop body
LE: loop exit
PB: predicated region body
PF: predicated region fallthrough
CT: control target
= control target key end

     0   :  { %16 = vsyncpa [#allocation4], 0  ;;  %s1099_s0 = inlined_call_operand.vmem [shape: f32[8,256], index: 0, kind: input, shape index: {}]   ;;  %s1100_s1 = inlined_call_operand.hbm [shape: f32[256,128], index: 1, kind: input, shape index: {}]   ;;  %s1101_s2 = inlined_call_operand.vmem [shape: f32[1,128], index: 2, kind: input, shape index: {}]   ;;  %s1102_s3 = inlined_call_operand.hbm [shape: f32[128,128], index: 3, kind: input, shape index: {}]   ;;  %s1103_s4 = inlined_call_operand.vmem [shape: f32[1,128], index: 4, kind: input, shape index: {}]   ;;  %s1104_s5 = inlined_call_operand.hbm [shape: f32[128,128], index: 5, kind: input, shape index: {}]   ;;  %s1105_s6 = inlined_call_operand.vmem [shape: f32[1,128], index: 6, kind: input, shape index: {}]   ;;  %s1106_s7 = inlined_call_operand.hbm [shape: f32[128,128], index: 7, kind: input, shape index: {}]   ;;  %s1107_s8 = inlined_call_operand.vmem [shape: f32[1,128], index: 8, kind: input, shape index: {}]   ;;  %s1108_s9 = inlined_call_operand.vmem [shape: f32[8,128], index: 9, kind: output, shape index: {0}]   ;;  %s1109_s10 = inlined_call_operand.vmem [shape: f32[8,128], index: 10, kind: output, shape index: {1}]  }
   0x1   :  { %17 = vsyncpa [#allocation6], 0 }
   0x2   :  { %18 = vsyncpa [#allocation9], 0  ;;  %s910_s13 = smov [#allocation5]   ;;  %s911_s15 = smov [#allocation3]  }
   0x3   :  { %s40_s14 = sshll.u32 %s910_s13, 4  ;;  %s26_s16 = sshll.u32 %s911_s15, 4  ;;  %s41_s14 = int_to_ptr.vmem [resolvable:$true] %s40_s14  ;;  %s974_s16 = int_to_ptr.vmem [resolvable:$true] %s26_s16 }
   0x4   :  { %s816_s19 = scalar_lea.hbm %s1102_s3, 2048 }
   0x5   :  { %p817_p0 = scmp.ne.s32.totalorder %s1102_s3, %s816_s19  ;;  %p820_p1 = scmp.lt.u32.totalorder %s816_s19, %s1102_s3 }
   0x7   :  { %p822_p2 = pnand %p820_p1, %p817_p0 }
   0x9   :  { %825 = shalt.err (!%p822_p2)
}
   0xa   :  { %s826_s24 = scalar_lea.vmem %s41_s14, 2048  ;;  %p831_p4 = scmp.lt.s32.totalorder %s41_s14, %s41_s14 }
   0xb   :  { %p827_p3 = scmp.ne.s32.totalorder %s41_s14, %s826_s24  ;;  %p832_p5 = scmp.lt.s32.totalorder %s826_s24, %s826_s24 }
   0xd   :  { %p833_p6 = por %p832_p5, %p831_p4 }
   0xf   :  { %p834_p7 = pnand %p833_p6, %p827_p3 }
  0x11   :  { %837 = shalt.err (!%p834_p7)
}
  0x12   :  { %s912_s25 = smov 128   ;;  %s913_s26 = smov 8  }
  0x13   :  { %46 = dma.hbm_to_vmem [thread:$0]  %s1102_s3, 2048, %s41_s14, [#allocation6], %s912_s25, %s912_s25, %s913_s26  }
  0x14   :  { %s838_s11 = scalar_lea.hbm %s1100_s1, 4096 }
  0x15   :  { %p839_p8 = scmp.ne.s32.totalorder %s1100_s1, %s838_s11  ;;  %p842_p9 = scmp.lt.u32.totalorder %s838_s11, %s1100_s1 }
  0x17   :  { %p844_p10 = pnand %p842_p9, %p839_p8 }
  0x19   :  { %847 = shalt.err (!%p844_p10)
}
  0x1a   :  { %s848_s18 = scalar_lea.vmem %s974_s16, 4096  ;;  %p853_p12 = scmp.lt.s32.totalorder %s974_s16, %s974_s16 }
  0x1b   :  { %p849_p11 = scmp.ne.s32.totalorder %s974_s16, %s848_s18  ;;  %p854_p13 = scmp.lt.s32.totalorder %s848_s18, %s848_s18 }
  0x1d   :  { %p855_p0 = por %p854_p13, %p853_p12 }
  0x1f   :  { %p856_p1 = pnand %p855_p0, %p849_p11 }
  0x21   :  { %859 = shalt.err (!%p856_p1)
}
  0x22   :  { %32 = dma.hbm_to_vmem [thread:$0]  %s1100_s1, 4096, %s974_s16, [#allocation4], %s912_s25, %s912_s25, %s913_s26  }
  0x23   :  { %s914_s19 = smov [#allocation7]   ;;  %s915_s21 = smov [#allocation8]  }
  0x24   :  { %s54_s20 = sshll.u32 %s914_s19, 4  ;;  %s68_s22 = sshll.u32 %s915_s21, 4  ;;  %s55_s20 = int_to_ptr.vmem [resolvable:$true] %s54_s20  ;;  %s1011_s22 = int_to_ptr.vmem [resolvable:$true] %s68_s22 }
  0x25   :  { %s860_s27 = scalar_lea.hbm %s1104_s5, 2048 }
  0x26   :  { %p861_p2 = scmp.ne.s32.totalorder %s1104_s5, %s860_s27  ;;  %p864_p3 = scmp.lt.u32.totalorder %s860_s27, %s1104_s5 }
  0x28   :  { %p866_p4 = pnand %p864_p3, %p861_p2 }
  0x2a   :  { %869 = shalt.err (!%p866_p4)
}
  0x2b   :  { %s870_s1 = scalar_lea.vmem %s55_s20, 2048  ;;  %p875_p6 = scmp.lt.s32.totalorder %s55_s20, %s55_s20 }
  0x2c   :  { %p871_p5 = scmp.ne.s32.totalorder %s55_s20, %s870_s1  ;;  %p876_p7 = scmp.lt.s32.totalorder %s870_s1, %s870_s1 }
  0x2e   :  { %p877_p8 = por %p876_p7, %p875_p6 }
  0x30   :  { %p878_p9 = pnand %p877_p8, %p871_p5 }
  0x32   :  { %881 = shalt.err (!%p878_p9)
}
  0x33   :  { %60 = dma.hbm_to_vmem [thread:$0]  %s1104_s5, 2048, %s55_s20, [#allocation6], %s912_s25, %s912_s25, %s913_s26  }
  0x34   :  { %s882_s17 = scalar_lea.hbm %s1106_s7, 2048 }
  0x35   :  { %p883_p10 = scmp.ne.s32.totalorder %s1106_s7, %s882_s17  ;;  %p886_p11 = scmp.lt.u32.totalorder %s882_s17, %s1106_s7 }
  0x37   :  { %p888_p12 = pnand %p886_p11, %p883_p10 }
  0x39   :  { %891 = shalt.err (!%p888_p12)
}
  0x3a   :  { %s892_s21 = scalar_lea.vmem %s1011_s22, 2048  ;;  %p897_p0 = scmp.lt.s32.totalorder %s1011_s22, %s1011_s22 }
  0x3b   :  { %p893_p13 = scmp.ne.s32.totalorder %s1011_s22, %s892_s21  ;;  %p898_p1 = scmp.lt.s32.totalorder %s892_s21, %s892_s21 }
  0x3d   :  { %p899_p2 = por %p898_p1, %p897_p0 }
  0x3f   :  { %p900_p3 = pnand %p899_p2, %p893_p13 }
  0x41   :  { %903 = shalt.err (!%p900_p3)
}
  0x42   :  { %74 = dma.hbm_to_vmem [thread:$0]  %s1106_s7, 2048, %s1011_s22, [#allocation9], %s912_s25, %s912_s25, %s913_s26  }
  0x43   :  { %904 = dma.done.wait [#allocation4], 4096  }
  0x44   :  { %905 = vsyncadd [#allocation4], 4294963200 }
  0x45   :  { %906 = dma.done.wait [#allocation6], 4096  }
  0x46   :  { %907 = vsyncadd [#allocation6], 4294963200 }
  0x47   :  { %908 = dma.done.wait [#allocation9], 2048  }
  0x48   :  { %909 = vsyncadd [#allocation9], 4294965248  ;;  %v916_v0 = vmov 0.0|0.0   ;;  %v113_v1 = vld [vmem:[#allocation3 + $0x80] sm:$0xff]  ;;  %v114_v2 = vld [vmem:[#allocation3 + $0x88] sm:$0xff]  ;;  %vm917_vm0 = vmmov 0  }
  0x49   :  { %735 = vmatprep.subr.bf16.mxu1 %v916_v0  ;;  %v97_v3 = vld [vmem:[#allocation3] sm:$0xff]  ;;  %v703_v4 = vpack.c.bf16 %v114_v2, %v113_v1  ;;  %v98_v5 = vld [vmem:[#allocation3 + $0x8] sm:$0xff]  ;;  %v115_v6 = vld [vmem:[#allocation3 + $0x90] sm:$0xff] }
  0x4a   :  { %v116_v7 = vld [vmem:[#allocation3 + $0x98] sm:$0xff]  ;;  %v705_v8 = vpack.c.bf16 %v98_v5, %v97_v3  ;;  %v99_v10 = vld [vmem:[#allocation3 + $0x10] sm:$0xff]  ;;  %v117_v12 = vld [vmem:[#allocation3 + $0xa0] sm:$0xff] }
  0x4b   :  { %v707_v9 = vpack.c.bf16 %v116_v7, %v115_v6  ;;  %v100_v11 = vld [vmem:[#allocation3 + $0x18] sm:$0xff]  ;;  %704 = vmatprep.subr.bf16.mxu0 %v703_v4  ;;  %v118_v13 = vld [vmem:[#allocation3 + $0xa8] sm:$0xff]  ;;  %v101_v16 = vld [vmem:[#allocation3 + $0x20] sm:$0xff] }
  0x4c   :  { %706 = vmatpush3.bf16.msra.mxu0 %v705_v8  ;;  %v709_v14 = vpack.c.bf16 %v100_v11, %v99_v10  ;;  %v711_v15 = vpack.c.bf16 %v118_v13, %v117_v12  ;;  %v102_v17 = vld [vmem:[#allocation3 + $0x28] sm:$0xff]  ;;  %v119_v18 = vld [vmem:[#allocation3 + $0xb0] sm:$0xff]  ;;  %v120_v19 = vld [vmem:[#allocation3 + $0xb8] sm:$0xff]  ;;  %v918_v12 = vmov 0.0  }
  0x4d   :  { %708 = vmatprep.subr.bf16.mxu0 %v707_v9  ;;  %v713_v20 = vpack.c.bf16 %v102_v17, %v101_v16  ;;  %v715_v21 = vpack.c.bf16 %v120_v19, %v119_v18  ;;  %v103_v22 = vld [vmem:[#allocation3 + $0x30] sm:$0xff]  ;;  %v104_v23 = vld [vmem:[#allocation3 + $0x38] sm:$0xff]  ;;  %v121_v24 = vld [vmem:[#allocation3 + $0xc0] sm:$0xff]  ;;  %630 = vmatprep.mubr.msk.f32.mxu1 %vm917_vm0, %v918_v12 }
  0x4e   :  { %v122_v25 = vld [vmem:[#allocation3 + $0xc8] sm:$0xff]  ;;  %v214_v27 = vld [vmem:[#allocation5] sm:$0xff]  ;;  %v717_v29 = vpack.c.bf16 %v104_v23, %v103_v22  ;;  %v216_v31 = vld [vmem:[#allocation5 + $0x10] sm:$0xff] }
  0x4f   :  { %v96_v26 = vld [vmem:[%s1099_s0 + $0x8] sm:$0xff]  ;;  %v217_v32 = vld [vmem:[#allocation5 + $0x18] sm:$0xff]  ;;  %v719_v33 = vpack.c.bf16 %v122_v25, %v121_v24  ;;  %v105_v34 = vld [vmem:[#allocation3 + $0x40] sm:$0xff] }
  0x50   :  { %710 = vmatpush3.bf16.msra.mxu0 %v709_v14  ;;  %193 = vmatprep.mubr.f32.mxu0 %v96_v26  ;;  %v215_v28 = vld [vmem:[#allocation5 + $0x8] sm:$0xff]  ;;  %v123_v36 = vld [vmem:[#allocation3 + $0xd0] sm:$0xff]  ;;  %v124_v37 = vld [vmem:[#allocation3 + $0xd8] sm:$0xff]  ;;  %v739_v38 = vpack.c.bf16 %v217_v32, %v216_v31 }
  0x51   :  { %712 = vmatprep.subr.bf16.mxu0 %v711_v15  ;;  %v736_v30 = vpack.c.bf16 %v215_v28, %v214_v27  ;;  %v106_v35 = vld [vmem:[#allocation3 + $0x48] sm:$0xff]  ;;  %v218_v39 = vld [vmem:[#allocation5 + $0x20] sm:$0xff]  ;;  %v723_v42 = vpack.c.bf16 %v124_v37, %v123_v36  ;;  %v107_v43 = vld [vmem:[#allocation3 + $0x50] sm:$0xff] }
  0x52   :  { %v219_v40 = vld [vmem:[#allocation5 + $0x28] sm:$0xff]  ;;  %v721_v41 = vpack.c.bf16 %v106_v35, %v105_v34  ;;  %v108_v44 = vld [vmem:[#allocation3 + $0x58] sm:$0xff]  ;;  %v125_v45 = vld [vmem:[#allocation3 + $0xe0] sm:$0xff] }
  0x53   :  { %737 = vmatpush3.bf16.msra.mxu1 %v736_v30  ;;  %v126_v46 = vld [vmem:[#allocation3 + $0xe8] sm:$0xff]  ;;  %v742_v47 = vpack.c.bf16 %v219_v40, %v218_v39  ;;  %v220_v48 = vld [vmem:[#allocation5 + $0x30] sm:$0xff]  ;;  %v221_v49 = vld [vmem:[#allocation5 + $0x38] sm:$0xff]  ;;  %v725_v50 = vpack.c.bf16 %v108_v44, %v107_v43 }
  0x54   :  { %714 = vmatpush3.bf16.msra.mxu0 %v713_v20  ;;  %738 = vmatprep.subr.bf16.mxu1 %v916_v0  ;;  %v727_v51 = vpack.c.bf16 %v126_v46, %v125_v45  ;;  %v109_v52 = vld [vmem:[#allocation3 + $0x60] sm:$0xff]  ;;  %v110_v53 = vld [vmem:[#allocation3 + $0x68] sm:$0xff]  ;;  %v127_v54 = vld [vmem:[#allocation3 + $0xf0] sm:$0xff]  ;;  %v745_v56 = vpack.c.bf16 %v221_v49, %v220_v48 }
  0x55   :  { %716 = vmatprep.subr.bf16.mxu0 %v715_v21  ;;  %v128_v55 = vld [vmem:[#allocation3 + $0xf8] sm:$0xff]  ;;  %v222_v57 = vld [vmem:[#allocation5 + $0x40] sm:$0xff]  ;;  %v223_v58 = vld [vmem:[#allocation5 + $0x48] sm:$0xff]  ;;  %v729_v59 = vpack.c.bf16 %v110_v53, %v109_v52 }
  0x56   :  { %v731_v60 = vpack.c.bf16 %v128_v55, %v127_v54  ;;  %v111_v61 = vld [vmem:[#allocation3 + $0x70] sm:$0xff]  ;;  %v112_v62 = vld [vmem:[#allocation3 + $0x78] sm:$0xff]  ;;  %v748_v63 = vpack.c.bf16 %v223_v58, %v222_v57  ;;  %v95_v5 = vld [vmem:[%s1099_s0] sm:$0xff] }
  0x57   :  { %740 = vmatpush3.bf16.msra.mxu1 %v739_v38  ;;  %v224_v1 = vld [vmem:[#allocation5 + $0x50] sm:$0xff]  ;;  %v225_v2 = vld [vmem:[#allocation5 + $0x58] sm:$0xff]  ;;  %v733_v3 = vpack.c.bf16 %v112_v62, %v111_v61  ;;  %v226_v6 = vld [vmem:[#allocation5 + $0x60] sm:$0xff] }
  0x58   :  { %718 = vmatpush3.bf16.msra.mxu0 %v717_v29  ;;  %741 = vmatprep.subr.bf16.mxu1 %v916_v0  ;;  %v751_v4 = vpack.c.bf16 %v225_v2, %v224_v1  ;;  %v227_v7 = vld [vmem:[#allocation5 + $0x68] sm:$0xff]  ;;  %v228_v9 = vld [vmem:[#allocation5 + $0x70] sm:$0xff]  ;;  %v229_v10 = vld [vmem:[#allocation5 + $0x78] sm:$0xff] }
  0x59   :  { %720 = vmatprep.subr.bf16.mxu0 %v719_v33  ;;  %v754_v8 = vpack.c.bf16 %v227_v7, %v226_v6  ;;  %v757_v11 = vpack.c.bf16 %v229_v10, %v228_v9  ;;  %v308_v13 = vld [vmem:[#allocation7] sm:$0xff]  ;;  %v309_v14 = vld [vmem:[#allocation7 + $0x8] sm:$0xff]  ;;  %v310_v15 = vld [vmem:[#allocation7 + $0x10] sm:$0xff] }
  0x5a   :  { %v760_v16 = vpack.c.bf16 %v309_v14, %v308_v13  ;;  %v311_v17 = vld [vmem:[#allocation7 + $0x18] sm:$0xff]  ;;  %v312_v19 = vld [vmem:[#allocation7 + $0x20] sm:$0xff]  ;;  %v313_v20 = vld [vmem:[#allocation7 + $0x28] sm:$0xff] }
  0x5b   :  { %743 = vmatpush3.bf16.msra.mxu1 %v742_v47  ;;  %v763_v18 = vpack.c.bf16 %v311_v17, %v310_v15  ;;  %v766_v21 = vpack.c.bf16 %v313_v20, %v312_v19  ;;  %v314_v22 = vld [vmem:[#allocation7 + $0x30] sm:$0xff]  ;;  %v315_v23 = vld [vmem:[#allocation7 + $0x38] sm:$0xff]  ;;  %v316_v25 = vld [vmem:[#allocation7 + $0x40] sm:$0xff] }
  0x5c   :  { %722 = vmatpush3.bf16.msra.mxu0 %v721_v41  ;;  %744 = vmatprep.subr.bf16.mxu1 %v916_v0  ;;  %v769_v24 = vpack.c.bf16 %v315_v23, %v314_v22  ;;  %v317_v26 = vld [vmem:[#allocation7 + $0x48] sm:$0xff]  ;;  %v318_v28 = vld [vmem:[#allocation7 + $0x50] sm:$0xff]  ;;  %v319_v29 = vld [vmem:[#allocation7 + $0x58] sm:$0xff] }
  0x5d   :  { %724 = vmatprep.subr.bf16.mxu0 %v723_v42  ;;  %v772_v27 = vpack.c.bf16 %v317_v26, %v316_v25  ;;  %v775_v30 = vpack.c.bf16 %v319_v29, %v318_v28  ;;  %v320_v31 = vld [vmem:[#allocation7 + $0x60] sm:$0xff]  ;;  %v321_v32 = vld [vmem:[#allocation7 + $0x68] sm:$0xff]  ;;  %v322_v40 = vld [vmem:[#allocation7 + $0x70] sm:$0xff] }
  0x5e   :  { %v778_v33 = vpack.c.bf16 %v321_v32, %v320_v31  ;;  %v508_v36 = vld [vmem:[%s1101_s2] ss:$0 sm:$0xff]  ;;  %v323_v41 = vld [vmem:[#allocation7 + $0x78] sm:$0xff]  ;;  %v404_v44 = vld [vmem:[#allocation8 + $0x8] sm:$0xff] }
  0x5f   :  { %746 = vmatpush3.bf16.msra.mxu1 %v745_v56  ;;  %v781_v42 = vpack.c.bf16 %v323_v41, %v322_v40  ;;  %v403_v43 = vld [vmem:[#allocation8] sm:$0xff]  ;;  %v405_v45 = vld [vmem:[#allocation8 + $0x10] sm:$0xff]  ;;  %v406_v47 = vld [vmem:[#allocation8 + $0x18] sm:$0xff] }
  0x60   :  { %726 = vmatpush3.bf16.msra.mxu0 %v725_v50  ;;  %747 = vmatprep.subr.bf16.mxu1 %v916_v0  ;;  %v784_v46 = vpack.c.bf16 %v404_v44, %v403_v43  ;;  %v787_v48 = vpack.c.bf16 %v406_v47, %v405_v45  ;;  %v407_v49 = vld [vmem:[#allocation8 + $0x20] sm:$0xff]  ;;  %v408_v50 = vld [vmem:[#allocation8 + $0x28] sm:$0xff]  ;;  %v409_v52 = vld [vmem:[#allocation8 + $0x30] sm:$0xff] }
  0x61   :  { %728 = vmatprep.subr.bf16.mxu0 %v727_v51  ;;  %v790_v51 = vpack.c.bf16 %v408_v50, %v407_v49  ;;  %v410_v53 = vld [vmem:[#allocation8 + $0x38] sm:$0xff]  ;;  %v411_v55 = vld [vmem:[#allocation8 + $0x40] sm:$0xff]  ;;  %v412_v56 = vld [vmem:[#allocation8 + $0x48] sm:$0xff] }
  0x62   :  { %v793_v54 = vpack.c.bf16 %v410_v53, %v409_v52  ;;  %v796_v57 = vpack.c.bf16 %v412_v56, %v411_v55  ;;  %v413_v58 = vld [vmem:[#allocation8 + $0x50] sm:$0xff]  ;;  %v415_v61 = vld [vmem:[#allocation8 + $0x60] sm:$0xff]  ;;  %v416_v62 = vld [vmem:[#allocation8 + $0x68] sm:$0xff] }
  0x63   :  { %749 = vmatpush3.bf16.msra.mxu1 %v748_v63  ;;  %v802_v63 = vpack.c.bf16 %v416_v62, %v415_v61  ;;  %v509_v1 = vld [vmem:[%s1103_s4] ss:$0 sm:$0xff]  ;;  %v417_v6 = vld [vmem:[#allocation8 + $0x70] sm:$0xff]  ;;  %v418_v7 = vld [vmem:[#allocation8 + $0x78] sm:$0xff] }
  0x64   :  { %730 = vmatpush3.bf16.msra.mxu0 %v729_v59  ;;  %750 = vmatprep.subr.bf16.mxu1 %v916_v0  ;;  %v414_v59 = vld [vmem:[#allocation8 + $0x58] sm:$0xff]  ;;  %v510_v9 = vld [vmem:[%s1105_s6] ss:$0 sm:$0xff] }
  0x65   :  { %732 = vmatprep.subr.bf16.mxu0 %v731_v60  ;;  %v799_v60 = vpack.c.bf16 %v414_v59, %v413_v58  ;;  %v511_v13 = vld [vmem:[%s1107_s8] ss:$0 sm:$0xff] }
  0x67   :  { %752 = vmatpush3.bf16.msra.mxu1 %v751_v4 }
  0x68   :  { %734 = vmatpush3.bf16.msra.mxu0 %v733_v3  ;;  %753 = vmatprep.subr.bf16.mxu1 %v916_v0 }
  0x69   :  { %759 = vmatprep.subr.bf16.mxu0 %v916_v0 }
  0x6b   :  { %194 = vmatmul.mubr.f32.vlgmr.msra.gmra.mrb[0].mxu0 %v95_v5  ;;  %755 = vmatpush3.bf16.msra.mxu1 %v754_v8  ;;  %v805_v8 = vpack.c.bf16 %v418_v7, %v417_v6 }
  0x6c   :  { %756 = vmatprep.subr.bf16.mxu1 %v916_v0  ;;  %665 = vmatprep.mubr.msk.f32.mxu0 %vm917_vm0, %v918_v12 }
  0x6d   :  { %761 = vmatpush3.bf16.msra.mxu0 %v760_v16 }
  0x6e   :  { %762 = vmatprep.subr.bf16.mxu0 %v916_v0 }
  0x6f   :  { %758 = vmatpush3.bf16.msra.mxu1 %v757_v11 }
  0x70   :  { %783 = vmatprep.subr.bf16.mxu1 %v916_v0 }
  0x71   :  { %764 = vmatpush3.bf16.msra.mxu0 %v763_v18 }
  0x72   :  { %765 = vmatprep.subr.bf16.mxu0 %v916_v0 }
  0x75   :  { %767 = vmatpush3.bf16.msra.mxu0 %v766_v21 }
  0x76   :  { %768 = vmatprep.subr.bf16.mxu0 %v916_v0 }
  0x79   :  { %770 = vmatpush3.bf16.msra.mxu0 %v769_v24 }
  0x7a   :  { %771 = vmatprep.subr.bf16.mxu0 %v916_v0 }
  0x7d   :  { %773 = vmatpush3.bf16.msra.mxu0 %v772_v27 }
  0x7e   :  { %774 = vmatprep.subr.bf16.mxu0 %v916_v0 }
  0x81   :  { %776 = vmatpush3.bf16.msra.mxu0 %v775_v30 }
  0x82   :  { %777 = vmatprep.subr.bf16.mxu0 %v916_v0 }
  0x85   :  { %779 = vmatpush3.bf16.msra.mxu0 %v778_v33 }
  0x86   :  { %780 = vmatprep.subr.bf16.mxu0 %v916_v0 }
  0x89   :  { %782 = vmatpush3.bf16.msra.mxu0 %v781_v42 }
 0x13e   :  { %v544_v34 = vpop.f32.mrb[0].mxu0 }
 0x13f   :  { %v545_v35 = vpop.f32.mrb[1].mxu0 }
 0x140   :  { %v546_v37 = vadd.f32 %v545_v35, %v544_v34 }
 0x142   :  { %v212_v38 = vadd.f32 %v546_v37, %v508_v36 }
 0x144   :  { %v213_v39 = vmax.f32 %v212_v38, 0.0 }
 0x146   :  { %631 = vmatmul.mubr.f32.vlgmr.msra.gmra.mrb[0].mxu1 %v213_v39 }
 0x147   :  { %700 = vmatprep.mubr.msk.f32.mxu1 %vm917_vm0, %v918_v12  ;;  %785 = vmatpush3.bf16.msra.mxu1 %v784_v46 }
 0x148   :  { %786 = vmatprep.subr.bf16.mxu1 %v916_v0 }
 0x14b   :  { %788 = vmatpush3.bf16.msra.mxu1 %v787_v48 }
 0x14c   :  { %789 = vmatprep.subr.bf16.mxu1 %v916_v0 }
 0x14f   :  { %791 = vmatpush3.bf16.msra.mxu1 %v790_v51 }
 0x150   :  { %792 = vmatprep.subr.bf16.mxu1 %v916_v0 }
 0x153   :  { %794 = vmatpush3.bf16.msra.mxu1 %v793_v54 }
 0x154   :  { %795 = vmatprep.subr.bf16.mxu1 %v916_v0 }
 0x157   :  { %797 = vmatpush3.bf16.msra.mxu1 %v796_v57 }
 0x158   :  { %798 = vmatprep.subr.bf16.mxu1 %v916_v0 }
 0x15b   :  { %800 = vmatpush3.bf16.msra.mxu1 %v799_v60 }
 0x15c   :  { %801 = vmatprep.subr.bf16.mxu1 %v916_v0 }
 0x15f   :  { %803 = vmatpush3.bf16.msra.mxu1 %v802_v63 }
 0x160   :  { %804 = vmatprep.subr.bf16.mxu1 %v916_v0 }
 0x163   :  { %806 = vmatpush3.bf16.msra.mxu1 %v805_v8 }
 0x219   :  { %v303_v2 = vpop.f32.mrb[0].mxu1 }
 0x21a   :  { %v304_v3 = vadd.f32 %v509_v1, %v303_v2  ;;  %v632_v4 = vpop.f32.mrb[1].mxu1 }
 0x21c   :  { %v307_v5 = vmax.f32 %v304_v3, 0.0 }
 0x21e   :  { %666 = vmatmul.mubr.f32.vlgmr.msra.gmra.mrb[2].mxu0 %v307_v5 }
 0x2f1   :  { %v397_v10 = vpop.f32.mrb[2].mxu0 }
 0x2f2   :  { %v398_v11 = vadd.f32 %v510_v9, %v397_v10  ;;  %v667_v0 = vpop.f32.mrb[3].mxu0 }
 0x2f4   :  { %v401_v12 = vmax.f32 %v398_v11, 0.0 }
 0x2f6   :  { %402 = vst [vmem:[%s1108_s9] sm:$0xff] %v401_v12  ;;  %701 = vmatmul.mubr.f32.vlgmr.msra.gmra.mrb[2].mxu1 %v401_v12 }
 0x3c9   :  { %v492_v14 = vpop.f32.mrb[2].mxu1 }
 0x3ca   :  { %v493_v15 = vadd.f32 %v511_v13, %v492_v14  ;;  %v702_v16 = vpop.f32.mrb[3].mxu1 }
 0x3cc   :  { %496 = vst [vmem:[%s1109_s10] sm:$0xff] %v493_v15 }
 0x3cd   :  { %505 = vsyncpa [#allocation4], 1 }
 0x3ce   :  { %506 = vsyncpa [#allocation6], 1 }
 0x3cf   :  { %507 = vsyncpa [#allocation9], 1 }

</bundles_post_ra>
